<compile_context>
chip_gen: v7x
topology: tpu7x:2x2x1
jax: 0.10.0
libtpu: 0.0.40
codegen_flags: <defaults>
</compile_context>

<pallas_src>
import functools

import jax
import jax.numpy as jnp
from jax import lax
from jax.experimental import pallas as pl
from jax.experimental.pallas import tpu as pltpu


def _resblock1d_kernel(x_ref, s1_ref, t1_ref, w1_ref, s2_ref, t2_ref, w2_ref,
                       b2_ref, o_ref, *, L, Lp, mm_dtype):
    # x_ref : (C, N)    N = nb*Lp lanes: nb samples, each padded to Lp columns
    # s1/t1 : (C, 1)    folded BN1 scale / shift
    # w1    : (H, 3C)   conv1 weights, taps concatenated along contraction axis
    # s2/t2 : (H, 1)    folded BN2 scale / shift (conv1 bias folded in)
    # w2    : (C, 3H)   conv2 weights, taps concatenated along contraction axis
    # b2    : (C, 1)    conv2 bias
    x = x_ref[...].astype(jnp.float32)
    N = x.shape[-1]
    nb = N // Lp

    # Position of each lane within its (padded) sample. Computed once, reused by
    # both convs (pure VPU filler otherwise). Lane-concat instead of modulo.
    pos = lax.broadcasted_iota(jnp.int32, (1, Lp), 1)
    if nb > 1:
        pos = jnp.concatenate([pos] * nb, axis=1)                    # (1, N)
    valid = pos < L          # inside the real sample (zero out padded columns)
    m1_ok = pos >= 1         # has a left neighbour within the sample
    p1_ok = pos <= L - 2     # has a right neighbour within the sample

    # --- BN1 (inference, folded) + ReLU; zeroed outside valid columns --------
    h = jnp.where(valid, jnp.maximum(s1_ref[...] * x + t1_ref[...], 0.0), 0.0)

    # --- conv1 (k=3 'same'): ONE MXU matmul over stacked shifted activations --
    h_m1 = jnp.where(m1_ok, pltpu.roll(h, 1, axis=1), 0.0)           # h[:, l-1]
    h_p1 = jnp.where(p1_ok, pltpu.roll(h, N - 1, axis=1), 0.0)       # h[:, l+1]
    a1 = jnp.concatenate([h_m1, h, h_p1], axis=0).astype(mm_dtype)   # (3C, N)
    y1 = jnp.dot(w1_ref[...], a1, preferred_element_type=jnp.float32)  # (H, N)

    # --- BN2 (inference, conv1 bias folded in) + ReLU -------------------------
    g = jnp.where(valid, jnp.maximum(s2_ref[...] * y1 + t2_ref[...], 0.0), 0.0)

    # --- conv2 (k=3 'same') ----------------------------------------------------
    g_m1 = jnp.where(m1_ok, pltpu.roll(g, 1, axis=1), 0.0)
    g_p1 = jnp.where(p1_ok, pltpu.roll(g, N - 1, axis=1), 0.0)
    a2 = jnp.concatenate([g_m1, g, g_p1], axis=0).astype(mm_dtype)   # (3H, N)
    y2 = jnp.dot(w2_ref[...], a2, preferred_element_type=jnp.float32)  # (C, N)

    # --- conv2 bias + residual, single (lane-dense) store per output element --
    o_ref[...] = (x + y2 + b2_ref[...]).astype(o_ref.dtype)


def resblock1d_forward(x, params, eps=1e-5, *,
                       matmul_dtype=jnp.bfloat16, lane_target=2048):
    """Fused ResBlock1d forward: x + conv2(relu(bn2(conv1(relu(bn1(x))))))."""
    assert x.ndim == 3, "expected (batch, channels, length) input"
    B, C, L = x.shape
    H = params["w1"].shape[0]
    assert params["w1"].shape == (H, C, 3)
    assert params["w2"].shape == (C, H, 3)
    assert L >= 2

    f32 = jnp.float32
    # TODO(synk): BatchNorm is implemented in inference mode (running statistics);
    # training-mode batch-statistic computation is not implemented in the kernel.
    inv1 = (params["gamma1"].astype(f32) / jnp.sqrt(params["var1"].astype(f32) + eps))
    s1 = inv1.reshape(C, 1)
    t1 = (params["beta1"].astype(f32) - params["mean1"].astype(f32) * inv1).reshape(C, 1)

    inv2 = (params["gamma2"].astype(f32) / jnp.sqrt(params["var2"].astype(f32) + eps))
    s2 = inv2.reshape(H, 1)
    # conv1 bias folded into BN2's shift: bn2(y1 + b1) = inv2*y1 + (beta2 + (b1-mean2)*inv2)
    t2 = (params["beta2"].astype(f32)
          + (params["b1"].astype(f32) - params["mean2"].astype(f32)) * inv2).reshape(H, 1)

    # Concatenate the 3 conv taps along the contraction axis -> one matmul per conv.
    # PyTorch conv1d 'same': out[:, l] = w[..,0]@x[l-1] + w[..,1]@x[l] + w[..,2]@x[l+1]
    w1f = params["w1"].astype(f32)
    w2f = params["w2"].astype(f32)
    w1cat = jnp.concatenate([w1f[:, :, k] for k in range(3)], axis=1).astype(matmul_dtype)  # (H, 3C)
    w2cat = jnp.concatenate([w2f[:, :, k] for k in range(3)], axis=1).astype(matmul_dtype)  # (C, 3H)
    b2 = params["b2"].astype(f32).reshape(C, 1)

    # Pad sample length to a multiple of 128 (lane-dense, unmasked stores) and
    # fold the batch onto the lane axis: (B, C, L) -> (C, B*Lp).
    Lp = ((L + 127) // 128) * 128
    x_in = x if Lp == L else jnp.pad(x, ((0, 0), (0, 0), (0, Lp - L)))
    x2d = jnp.transpose(x_in, (1, 0, 2)).reshape(C, B * Lp)

    # Samples per grid step: largest divisor of B whose tile stays <= lane_target lanes.
    nb = 1
    for d in range(1, B + 1):
        if B % d == 0 and d * Lp <= max(lane_target, Lp):
            nb = d
    TN = nb * Lp
    grid = (B // nb,)

    # TODO(synk): for very long L the (C, TN) tile plus temporaries should also be
    # L-tiled with 1-column halos (matters under v7x's 64 MiB VMEM); at these sizes
    # whole samples per tile keep the roll-based padding exact with no halos.
    out2d = pl.pallas_call(
        functools.partial(_resblock1d_kernel, L=L, Lp=Lp, mm_dtype=matmul_dtype),
        out_shape=jax.ShapeDtypeStruct((C, B * Lp), x.dtype),
        grid_spec=pltpu.PrefetchScalarGridSpec(
            num_scalar_prefetch=0,
            grid=grid,
            in_specs=[
                pl.BlockSpec((C, TN), lambda i: (0, i)),       # x (batch folded on lanes)
                pl.BlockSpec((C, 1), lambda i: (0, 0)),        # s1
                pl.BlockSpec((C, 1), lambda i: (0, 0)),        # t1
                pl.BlockSpec((H, 3 * C), lambda i: (0, 0)),    # w1cat
                pl.BlockSpec((H, 1), lambda i: (0, 0)),        # s2
                pl.BlockSpec((H, 1), lambda i: (0, 0)),        # t2
                pl.BlockSpec((C, 3 * H), lambda i: (0, 0)),    # w2cat
                pl.BlockSpec((C, 1), lambda i: (0, 0)),        # b2
            ],
            out_specs=pl.BlockSpec((C, TN), lambda i: (0, i)),
        ),
        compiler_params=pltpu.CompilerParams(
            dimension_semantics=("parallel",),
            vmem_limit_bytes=32 * 1024 * 1024,
        ),
    )(x2d, s1, t1, w1cat, s2, t2, w2cat, b2)

    out = out2d.reshape(C, B, Lp).transpose(1, 0, 2)
    if Lp != L:
        out = out[:, :, :L]
    return out


def _ref_forward(x, p, eps=1e-5):
    """Pure-JAX reference of the PyTorch forward (inference-mode BN)."""
    def bn(z, gamma, beta, mean, var):
        inv = gamma / jnp.sqrt(var + eps)
        return z * inv[None, :, None] + (beta - mean * inv)[None, :, None]

    def conv(z, w, b):
        y = lax.conv_general_dilated(z, w, window_strides=(1,), padding=[(1, 1)],
                                     dimension_numbers=("NCH", "OIH", "NCH"),
                                     precision=lax.Precision.HIGHEST)
        return y + b[None, :, None]

    h = jax.nn.relu(bn(x, p["gamma1"], p["beta1"], p["mean1"], p["var1"]))
    y1 = conv(h, p["w1"], p["b1"])
    g = jax.nn.relu(bn(y1, p["gamma2"], p["beta2"], p["mean2"], p["var2"]))
    y2 = conv(g, p["w2"], p["b2"])
    return x + y2


if __name__ == "__main__":
    key = jax.random.PRNGKey(0)
    ks = jax.random.split(key, 16)

    # hidden_channels == in_channels: the PyTorch module only runs correctly in that
    # configuration (its second BatchNorm1d is constructed with in_channels).
    B, C, H, L = 2, 8, 8, 128

    x = jax.random.normal(ks[0], (B, C, L), dtype=jnp.float32)
    params = {
        "gamma1": 1.0 + 0.1 * jax.random.normal(ks[1], (C,), jnp.float32),
        "beta1": 0.1 * jax.random.normal(ks[2], (C,), jnp.float32),
        "mean1": 0.1 * jax.random.normal(ks[3], (C,), jnp.float32),
        "var1": 1.0 + 0.1 * jax.random.uniform(ks[4], (C,), jnp.float32),
        "w1": 0.3 * jax.random.normal(ks[5], (H, C, 3), jnp.float32),
        "b1": 0.1 * jax.random.normal(ks[6], (H,), jnp.float32),
        "gamma2": 1.0 + 0.1 * jax.random.normal(ks[7], (H,), jnp.float32),
        "beta2": 0.1 * jax.random.normal(ks[8], (H,), jnp.float32),
        "mean2": 0.1 * jax.random.normal(ks[9], (H,), jnp.float32),
        "var2": 1.0 + 0.1 * jax.random.uniform(ks[10], (H,), jnp.float32),
        "w2": 0.3 * jax.random.normal(ks[11], (C, H, 3), jnp.float32),
        "b2": 0.1 * jax.random.normal(ks[12], (C,), jnp.float32),
    }

    ref = _ref_forward(x, params)

    # 1) f32 matmul operands: verifies the kernel math / folding tightly.
    out_f32 = jax.block_until_ready(resblock1d_forward(x, params, matmul_dtype=jnp.float32))
    assert out_f32.shape == ref.shape and out_f32.dtype == ref.dtype
    err_f32 = float(jnp.max(jnp.abs(out_f32 - ref)))
    assert jnp.allclose(out_f32, ref, atol=1e-3, rtol=1e-3), \
        f"f32-operand path mismatch (max abs err {err_f32})"

    # 2) default fast path: bf16 matmul operands, f32 accumulation.
    out = jax.block_until_ready(resblock1d_forward(x, params))
    err_bf16 = float(jnp.max(jnp.abs(out - ref)))
    assert out.shape == ref.shape and out.dtype == ref.dtype
    assert jnp.allclose(out, ref, atol=5e-2, rtol=5e-2), \
        f"bf16-operand path mismatch (max abs err {err_bf16})"

    print("KERNEL_OK")
</pallas_src>

<mosaic_0001>
module attributes {stable_mosaic.version = 11 : i64} {
  func.func @_resblock1d_kernel(%arg0: i32, %arg1: memref<8x256xf32, #tpu.memory_space<vmem>>, %arg2: memref<8x1xf32, #tpu.memory_space<vmem>>, %arg3: memref<8x1xf32, #tpu.memory_space<vmem>>, %arg4: memref<8x24xf32, #tpu.memory_space<vmem>>, %arg5: memref<8x1xf32, #tpu.memory_space<vmem>>, %arg6: memref<8x1xf32, #tpu.memory_space<vmem>>, %arg7: memref<8x24xf32, #tpu.memory_space<vmem>>, %arg8: memref<8x1xf32, #tpu.memory_space<vmem>>, %arg9: memref<8x256xf32, #tpu.memory_space<vmem>>) attributes {dimension_semantics = [#tpu.dimension_semantics<parallel>], iteration_bounds = array<i64: 1>, scalar_prefetch = 0 : i64, scratch_operands = 0 : i64, tpu.core_type = #tpu.core_type<tc>, window_params = [{transform_indices = @transform_0, window_bounds = array<i64: 8, 256>}, {pipeline_mode = #tpu.pipeline_mode<synchronous>, transform_indices = @transform_1, window_bounds = array<i64: 8, 1>}, {pipeline_mode = #tpu.pipeline_mode<synchronous>, transform_indices = @transform_2, window_bounds = array<i64: 8, 1>}, {pipeline_mode = #tpu.pipeline_mode<synchronous>, transform_indices = @transform_3, window_bounds = array<i64: 8, 24>}, {pipeline_mode = #tpu.pipeline_mode<synchronous>, transform_indices = @transform_4, window_bounds = array<i64: 8, 1>}, {pipeline_mode = #tpu.pipeline_mode<synchronous>, transform_indices = @transform_5, window_bounds = array<i64: 8, 1>}, {pipeline_mode = #tpu.pipeline_mode<synchronous>, transform_indices = @transform_6, window_bounds = array<i64: 8, 24>}, {pipeline_mode = #tpu.pipeline_mode<synchronous>, transform_indices = @transform_7, window_bounds = array<i64: 8, 1>}, {transform_indices = @transform_8, window_bounds = array<i64: 8, 256>}]} {
    %c0 = arith.constant 0 : index
    %c0_0 = arith.constant 0 : index
    %0 = vector.load %arg1[%c0, %c0_0] : memref<8x256xf32, #tpu.memory_space<vmem>>, vector<8x256xf32>
    %1 = tpu.iota {dimensions = array<i32: 1>} : vector<1x128xi32>
    %2 = tpu.concatenate %1, %1 in 1 : vector<1x128xi32>, vector<1x128xi32> -> vector<1x256xi32>
    %c128_i32 = arith.constant 128 : i32
    %3 = vector.broadcast %c128_i32 : i32 to vector<1x256xi32>
    %4 = arith.cmpi slt, %2, %3 : vector<1x256xi32>
    %c1_i32 = arith.constant 1 : i32
    %5 = vector.broadcast %c1_i32 : i32 to vector<1x256xi32>
    %6 = arith.cmpi sge, %2, %5 : vector<1x256xi32>
    %c126_i32 = arith.constant 126 : i32
    %7 = vector.broadcast %c126_i32 : i32 to vector<1x256xi32>
    %8 = arith.cmpi sle, %2, %7 : vector<1x256xi32>
    %c0_1 = arith.constant 0 : index
    %c0_2 = arith.constant 0 : index
    %9 = vector.load %arg2[%c0_1, %c0_2] : memref<8x1xf32, #tpu.memory_space<vmem>>, vector<8x1xf32>
    %10 = vector.broadcast %9 : vector<8x1xf32> to vector<8x256xf32>
    %11 = arith.mulf %10, %0 : vector<8x256xf32>
    %c0_3 = arith.constant 0 : index
    %c0_4 = arith.constant 0 : index
    %12 = vector.load %arg3[%c0_3, %c0_4] : memref<8x1xf32, #tpu.memory_space<vmem>>, vector<8x1xf32>
    %13 = vector.broadcast %12 : vector<8x1xf32> to vector<8x256xf32>
    %14 = arith.addf %11, %13 : vector<8x256xf32>
    %cst = arith.constant 0.000000e+00 : f32
    %15 = vector.broadcast %cst : f32 to vector<8x256xf32>
    %16 = arith.maximumf %14, %15 : vector<8x256xf32>
    %cst_5 = arith.constant 0.000000e+00 : f32
    %17 = vector.shape_cast %4 : vector<1x256xi1> to vector<1x256xi1>
    %18 = vector.broadcast %17 : vector<1x256xi1> to vector<8x256xi1>
    %19 = vector.broadcast %cst_5 : f32 to vector<8x256xf32>
    %20 = arith.select %18, %16, %19 : vector<8x256xi1>, vector<8x256xf32>
    %c1_i32_6 = arith.constant 1 : i32
    %21 = tpu.dynamic_rotate %20 by %c1_i32_6 dim 1 : vector<8x256xf32>, i32 -> vector<8x256xf32>
    %cst_7 = arith.constant 0.000000e+00 : f32
    %22 = vector.shape_cast %6 : vector<1x256xi1> to vector<1x256xi1>
    %23 = vector.broadcast %22 : vector<1x256xi1> to vector<8x256xi1>
    %24 = vector.broadcast %cst_7 : f32 to vector<8x256xf32>
    %25 = arith.select %23, %21, %24 : vector<8x256xi1>, vector<8x256xf32>
    %c255_i32 = arith.constant 255 : i32
    %26 = tpu.dynamic_rotate %20 by %c255_i32 dim 1 : vector<8x256xf32>, i32 -> vector<8x256xf32>
    %cst_8 = arith.constant 0.000000e+00 : f32
    %27 = vector.shape_cast %8 : vector<1x256xi1> to vector<1x256xi1>
    %28 = vector.broadcast %27 : vector<1x256xi1> to vector<8x256xi1>
    %29 = vector.broadcast %cst_8 : f32 to vector<8x256xf32>
    %30 = arith.select %28, %26, %29 : vector<8x256xi1>, vector<8x256xf32>
    %31 = tpu.concatenate %25, %20, %30 in 0 : vector<8x256xf32>, vector<8x256xf32>, vector<8x256xf32> -> vector<24x256xf32>
    %c0_9 = arith.constant 0 : index
    %c0_10 = arith.constant 0 : index
    %32 = vector.load %arg4[%c0_9, %c0_10] : memref<8x24xf32, #tpu.memory_space<vmem>>, vector<8x24xf32>
    %cst_11 = arith.constant dense<0.000000e+00> : vector<8x256xf32>
    %33 = tpu.matmul %32, %31, %cst_11 {dimension_numbers = #tpu.dot_dimension_numbers<[1], [0], [0], [1], [0, 0, 1, 1], [], []>} : vector<8x24xf32>, vector<24x256xf32>, vector<8x256xf32> -> vector<8x256xf32>
    %c0_12 = arith.constant 0 : index
    %c0_13 = arith.constant 0 : index
    %34 = vector.load %arg5[%c0_12, %c0_13] : memref<8x1xf32, #tpu.memory_space<vmem>>, vector<8x1xf32>
    %35 = vector.broadcast %34 : vector<8x1xf32> to vector<8x256xf32>
    %36 = arith.mulf %35, %33 : vector<8x256xf32>
    %c0_14 = arith.constant 0 : index
    %c0_15 = arith.constant 0 : index
    %37 = vector.load %arg6[%c0_14, %c0_15] : memref<8x1xf32, #tpu.memory_space<vmem>>, vector<8x1xf32>
    %38 = vector.broadcast %37 : vector<8x1xf32> to vector<8x256xf32>
    %39 = arith.addf %36, %38 : vector<8x256xf32>
    %cst_16 = arith.constant 0.000000e+00 : f32
    %40 = vector.broadcast %cst_16 : f32 to vector<8x256xf32>
    %41 = arith.maximumf %39, %40 : vector<8x256xf32>
    %cst_17 = arith.constant 0.000000e+00 : f32
    %42 = vector.shape_cast %4 : vector<1x256xi1> to vector<1x256xi1>
    %43 = vector.broadcast %42 : vector<1x256xi1> to vector<8x256xi1>
    %44 = vector.broadcast %cst_17 : f32 to vector<8x256xf32>
    %45 = arith.select %43, %41, %44 : vector<8x256xi1>, vector<8x256xf32>
    %c1_i32_18 = arith.constant 1 : i32
    %46 = tpu.dynamic_rotate %45 by %c1_i32_18 dim 1 : vector<8x256xf32>, i32 -> vector<8x256xf32>
    %cst_19 = arith.constant 0.000000e+00 : f32
    %47 = vector.shape_cast %6 : vector<1x256xi1> to vector<1x256xi1>
    %48 = vector.broadcast %47 : vector<1x256xi1> to vector<8x256xi1>
    %49 = vector.broadcast %cst_19 : f32 to vector<8x256xf32>
    %50 = arith.select %48, %46, %49 : vector<8x256xi1>, vector<8x256xf32>
    %c255_i32_20 = arith.constant 255 : i32
    %51 = tpu.dynamic_rotate %45 by %c255_i32_20 dim 1 : vector<8x256xf32>, i32 -> vector<8x256xf32>
    %cst_21 = arith.constant 0.000000e+00 : f32
    %52 = vector.shape_cast %8 : vector<1x256xi1> to vector<1x256xi1>
    %53 = vector.broadcast %52 : vector<1x256xi1> to vector<8x256xi1>
    %54 = vector.broadcast %cst_21 : f32 to vector<8x256xf32>
    %55 = arith.select %53, %51, %54 : vector<8x256xi1>, vector<8x256xf32>
    %56 = tpu.concatenate %50, %45, %55 in 0 : vector<8x256xf32>, vector<8x256xf32>, vector<8x256xf32> -> vector<24x256xf32>
    %c0_22 = arith.constant 0 : index
    %c0_23 = arith.constant 0 : index
    %57 = vector.load %arg7[%c0_22, %c0_23] : memref<8x24xf32, #tpu.memory_space<vmem>>, vector<8x24xf32>
    %cst_24 = arith.constant dense<0.000000e+00> : vector<8x256xf32>
    %58 = tpu.matmul %57, %56, %cst_24 {dimension_numbers = #tpu.dot_dimension_numbers<[1], [0], [0], [1], [0, 0, 1, 1], [], []>} : vector<8x24xf32>, vector<24x256xf32>, vector<8x256xf32> -> vector<8x256xf32>
    %59 = arith.addf %0, %58 : vector<8x256xf32>
    %c0_25 = arith.constant 0 : index
    %c0_26 = arith.constant 0 : index
    %60 = vector.load %arg8[%c0_25, %c0_26] : memref<8x1xf32, #tpu.memory_space<vmem>>, vector<8x1xf32>
    %61 = vector.broadcast %60 : vector<8x1xf32> to vector<8x256xf32>
    %62 = arith.addf %59, %61 : vector<8x256xf32>
    %c0_27 = arith.constant 0 : index
    %c0_28 = arith.constant 0 : index
    %63 = vector.load %arg9[%c0_27, %c0_28] : memref<8x256xf32, #tpu.memory_space<vmem>>, vector<8x256xf32>
    tpu.vector_store %arg9[%c0_27, %c0_28], %62 {strides = array<i32>} : memref<8x256xf32, #tpu.memory_space<vmem>>, vector<8x256xf32>,
    return
  }
  func.func @transform_0(%arg0: i32) -> (i32, i32) {
    %c0_i32 = arith.constant 0 : i32
    %c0_i32_0 = arith.constant 0 : i32
    return %c0_i32, %arg0 : i32, i32
  }
  func.func @transform_1(%arg0: i32) -> (i32, i32) {
    %c0_i32 = arith.constant 0 : i32
    %c0_i32_0 = arith.constant 0 : i32
    %c0_i32_1 = arith.constant 0 : i32
    return %c0_i32, %c0_i32_0 : i32, i32
  }
  func.func @transform_2(%arg0: i32) -> (i32, i32) {
    %c0_i32 = arith.constant 0 : i32
    %c0_i32_0 = arith.constant 0 : i32
    %c0_i32_1 = arith.constant 0 : i32
    return %c0_i32, %c0_i32_0 : i32, i32
  }
  func.func @transform_3(%arg0: i32) -> (i32, i32) {
    %c0_i32 = arith.constant 0 : i32
    %c0_i32_0 = arith.constant 0 : i32
    %c0_i32_1 = arith.constant 0 : i32
    return %c0_i32, %c0_i32_0 : i32, i32
  }
  func.func @transform_4(%arg0: i32) -> (i32, i32) {
    %c0_i32 = arith.constant 0 : i32
    %c0_i32_0 = arith.constant 0 : i32
    %c0_i32_1 = arith.constant 0 : i32
    return %c0_i32, %c0_i32_0 : i32, i32
  }
  func.func @transform_5(%arg0: i32) -> (i32, i32) {
    %c0_i32 = arith.constant 0 : i32
    %c0_i32_0 = arith.constant 0 : i32
    %c0_i32_1 = arith.constant 0 : i32
    return %c0_i32, %c0_i32_0 : i32, i32
  }
  func.func @transform_6(%arg0: i32) -> (i32, i32) {
    %c0_i32 = arith.constant 0 : i32
    %c0_i32_0 = arith.constant 0 : i32
    %c0_i32_1 = arith.constant 0 : i32
    return %c0_i32, %c0_i32_0 : i32, i32
  }
  func.func @transform_7(%arg0: i32) -> (i32, i32) {
    %c0_i32 = arith.constant 0 : i32
    %c0_i32_0 = arith.constant 0 : i32
    %c0_i32_1 = arith.constant 0 : i32
    return %c0_i32, %c0_i32_0 : i32, i32
  }
  func.func @transform_8(%arg0: i32) -> (i32, i32) {
    %c0_i32 = arith.constant 0 : i32
    %c0_i32_0 = arith.constant 0 : i32
    return %c0_i32, %arg0 : i32, i32
  }
}

</mosaic_0001>

<bundles_post_ra>
// kernel: tpu_custom_call.1
= control target key start
LH: loop header
LB: loop body
LE: loop exit
PB: predicated region body
PF: predicated region fallthrough
CT: control target
= control target key end

     0   :  { %s539_s0 = inlined_call_operand.vmem [shape: f32[8,256], index: 0, kind: input, shape index: {}]   ;;  %s540_s1 = inlined_call_operand.vmem [shape: f32[8,1], index: 1, kind: input, shape index: {}]   ;;  %s541_s2 = inlined_call_operand.vmem [shape: f32[8,1], index: 2, kind: input, shape index: {}]   ;;  %s542_s3 = inlined_call_operand.vmem [shape: f32[8,24], index: 3, kind: input, shape index: {}]   ;;  %s543_s4 = inlined_call_operand.vmem [shape: f32[8,1], index: 4, kind: input, shape index: {}]   ;;  %s544_s5 = inlined_call_operand.vmem [shape: f32[8,1], index: 5, kind: input, shape index: {}]   ;;  %s545_s6 = inlined_call_operand.vmem [shape: f32[8,24], index: 6, kind: input, shape index: {}]   ;;  %s546_s7 = inlined_call_operand.vmem [shape: f32[8,1], index: 7, kind: input, shape index: {}]   ;;  %s547_s8 = inlined_call_operand.hbm [shape: f32[8,256], index: 8, kind: output, shape index: {}]  }
   0x1   :  { %v37_v0 = vld [vmem:[%s540_s1] sm:$0xff] }
   0x2   :  { %13 = vsyncpa [#allocation3], 0  ;;  %v374_v1 = vmov 0   ;;  %v45_v2 = vld [vmem:[%s541_s2] sm:$0xff]  ;;  %v32_v3 = vlaneseq  ;;  %v439_v8 = vld [vmem:[%s539_s0 + $0x8] sm:$0xff]  ;;  %v375_v9 = vmov 1  }
   0x3   :  { %338 = vset.pattern.permute.xlu0 %v374_v1  ;;  %344 = vset.pattern.permute.xlu1 %v374_v1  ;;  %v434_v7 = vld [vmem:[%s539_s0] sm:$0xff]  ;;  %v376_v20 = vmov 0.0   ;;  %s377_s0 = smov 127   ;;  %s378_s13 = smov 1   ;;  %vm94_vm8 = vcmask 195584  }
   0x4   :  { %40 = vperm.xlu0 %338, %v37_v0   ;;  %v57_v4 = vshrl.u32 %v32_v3, 7  ;;  %162 = vmatprep.mubr.f32.mxu0 %v376_v20  ;;  %v177_v22 = vld [vmem:[%s544_s5] sm:$0xff]  ;;  %v459_v24 = vand.u32 127, %v32_v3  ;;  %s379_s18 = smov [#allocation2]  }
   0x5   :  { %273 = vmatprep.mubr.f32.mxu1 %v376_v20  ;;  %v169_v23 = vld [vmem:[%s543_s4] sm:$0xff]  ;;  %s298_s19 = sshll.u32 %s379_s18, 4  ;;  %s299_s19 = int_to_ptr.vmem [resolvable:$true] %s298_s19 }
   0x6   :  { %v58_v5 = vsub.s32 0, %v57_v4  ;;  %vm35_vm1 = vcmp.ge.s32.totalorder %v459_v24, 1  ;;  %vm36_vm2 = vcmp.le.s32.totalorder %v459_v24, 126  ;;  %vm67_vm3 = vcmp.lt.s32.totalorder %v459_v24, 1  ;;  %v93_v41 = vld [vmem:[%s542_s3] sm:$0xff]  ;;  %p355_p1 = scmp.lt.s32.totalorder %s299_s19, %s299_s19 }
   0x7   :  { %v70_v25 = vsel %vm35_vm1, 1, %v374_v1  ;;  %v85_v27 = vsel %vm36_vm2, 1, %v374_v1  ;;  %vm82_vm6 = vcmp.lt.s32.totalorder %v459_v24, 127  ;;  %v282_v56 = vld [vmem:[%s546_s7] sm:$0xff] }
   0x8   :  { %48 = vperm.xlu0 %338, %v45_v2   ;;  %v441_v10 = vrot.slane %v375_v9, %v58_v5  ;;  %v74_v26 = vrot.slane %v70_v25, %v58_v5  ;;  %v89_v31 = vrot.slane %v85_v27, %v58_v5  ;;  %v205_v3 = vld [vmem:[%s545_s6] sm:$0xff]  ;;  %s350_s6 = scalar_lea.vmem %s299_s19, 256 }
   0x9   :  { %p351_p0 = scmp.ne.s32.totalorder %s299_s19, %s350_s6  ;;  %p356_p2 = scmp.lt.s32.totalorder %s350_s6, %s350_s6 }
   0xa   :  { %vm60_vm0 = vcmp.eq.s32.totalorder %v441_v10, 1  ;;  %vm75_vm4 = vcmp.eq.s32.totalorder %v74_v26, 1  ;;  %vm475_vm7 = vcmp.eq.s32.totalorder %v89_v31, 1 }
   0xb   :  { %vm468_vm5 = vmpackc.low %vm60_vm0, %vm75_vm4  ;;  %p357_p3 = por %p356_p2, %p355_p1 }
   0xd   :  { %p358_p4 = pnand %p357_p3, %p351_p0 }
  0x83   :  { %v41_v6 = vpop.permute.xlu0 %40 }
  0x84   :  { %v43_v11 = vmul.f32 %v41_v6, %v434_v7  ;;  %v44_v12 = vmul.f32 %v41_v6, %v439_v8 }
  0x87   :  { %v49_v13 = vpop.permute.xlu0 %48 }
  0x88   :  { %v51_v14 = vadd.f32 %v49_v13, %v43_v11  ;;  %v52_v15 = vadd.f32 %v49_v13, %v44_v12 }
  0x8a   :  { %v53_v16 = vmax.f32 %v51_v14, 0.0  ;;  %v54_v17 = vmax.f32 %v52_v15, 0.0 }
  0x8c   :  { %v62_v18 = vsel %vm60_vm0, %v54_v17, 0.0  ;;  %v61_v19 = vsel %vm60_vm0, %v53_v16, 0.0 }
  0x8d   :  { %80 = vrot.lane.b32.xlu0 %v62_v18, %s377_s0  ;;  %v339_v21 = vpack.i.bf16 %v62_v18, %v61_v19 }
  0x8f   :  { %340 = vrot.lane.b32.xlu1 %v339_v21, %s378_s13 }
  0x91   :  { %180 = vperm.xlu0 %338, %v177_v22  }
  0x93   :  { %78 = vrot.lane.b32.xlu1 %v61_v19, %s377_s0 }
  0x97   :  { %172 = vperm.xlu1 %344, %v169_v23  }
  0xff   :  { %v81_v39 = vpop.permute.xlu0 %80 }
 0x101   :  { %v341_v28 = vpop.permute.xlu1 %340 }
 0x102   :  { %v343_v29 = vunpack.i.h.bf16 %v341_v28  ;;  %v342_v30 = vunpack.i.l.bf16 %v341_v28 }
 0x104   :  { %v68_v32 = vsel %vm67_vm3, %v342_v30, %v343_v29  ;;  %v69_v34 = vsel %vm67_vm3, %v343_v29, %v342_v30 }
 0x105   :  { %v79_v35 = vpop.permute.xlu1 %78  ;;  %v320_v36 = vpack.c.bf16 %v54_v17, %v68_v32  ;;  %v323_v37 = vpack.c.bf16 %v53_v16, %v69_v34 }
 0x106   :  { %v84_v40 = vsel %vm82_vm6, %v81_v39, %v79_v35  ;;  %v83_v42 = vsel %vm82_vm6, %v79_v35, %v81_v39 }
 0x107   :  { %322 = vmatprep.subr.msk.bf16.mxu0 %vm468_vm5, %v320_v36 }
 0x108   :  { %325 = vmatpush1.bf16.msk.msra.mxu0 %vm468_vm5, %v323_v37 }
 0x109   :  { %310 = vmatprep.subr.msk.mxu0 %vm475_vm7, %v84_v40 }
 0x10c   :  { %311 = vmatpush1.msk.msra.mxu0 %vm475_vm7, %v83_v42 }
 0x10d   :  { %312 = vmatmul.mubr.msk.f32.vlgmr.msra.gmra.mrb[0].mxu0 %vm94_vm8, %v93_v41 }
 0x110   :  { %v181_v47 = vpop.permute.xlu0 %180 }
 0x116   :  { %v173_v43 = vpop.permute.xlu1 %172 }
 0x1e0   :  { %v164_v44 = vpop.f32.mrb[0].mxu0 }
 0x1e1   :  { %v175_v45 = vmul.f32 %v173_v43, %v164_v44  ;;  %v166_v46 = vpop.f32.mrb[1].mxu0 }
 0x1e2   :  { %v176_v48 = vmul.f32 %v173_v43, %v166_v46 }
 0x1e3   :  { %v183_v49 = vadd.f32 %v181_v47, %v175_v45 }
 0x1e4   :  { %v184_v50 = vadd.f32 %v181_v47, %v176_v48 }
 0x1e5   :  { %v185_v51 = vmax.f32 %v183_v49, 0.0 }
 0x1e6   :  { %v186_v52 = vmax.f32 %v184_v50, 0.0 }
 0x1e7   :  { %v187_v53 = vsel %vm60_vm0, %v185_v51, 0.0 }
 0x1e8   :  { %197 = vrot.lane.b32.xlu0 %v187_v53, %s377_s0  ;;  %v188_v54 = vsel %vm60_vm0, %v186_v52, 0.0 }
 0x1e9   :  { %v345_v55 = vpack.i.bf16 %v188_v54, %v187_v53 }
 0x1eb   :  { %346 = vrot.lane.b32.xlu1 %v345_v55, %s378_s13 }
 0x1ec   :  { %285 = vperm.xlu0 %338, %v282_v56  }
 0x1ef   :  { %199 = vrot.lane.b32.xlu1 %v188_v54, %s377_s0 }
 0x25a   :  { %v198_v1 = vpop.permute.xlu0 %197 }
 0x25d   :  { %v347_v57 = vpop.permute.xlu1 %346 }
 0x25e   :  { %v349_v58 = vunpack.i.h.bf16 %v347_v57  ;;  %v348_v59 = vunpack.i.l.bf16 %v347_v57 }
 0x260   :  { %v193_v60 = vsel %vm67_vm3, %v348_v59, %v349_v58  ;;  %v194_v61 = vsel %vm67_vm3, %v349_v58, %v348_v59 }
 0x261   :  { %v200_v62 = vpop.permute.xlu1 %199  ;;  %v326_v63 = vpack.c.bf16 %v186_v52, %v193_v60  ;;  %v329_v0 = vpack.c.bf16 %v185_v51, %v194_v61 }
 0x262   :  { %v202_v2 = vsel %vm82_vm6, %v200_v62, %v198_v1  ;;  %v201_v4 = vsel %vm82_vm6, %v198_v1, %v200_v62 }
 0x263   :  { %328 = vmatprep.subr.msk.bf16.mxu1 %vm468_vm5, %v326_v63 }
 0x264   :  { %331 = vmatpush1.bf16.msk.msra.mxu1 %vm468_vm5, %v329_v0 }
 0x265   :  { %317 = vmatprep.subr.msk.mxu1 %vm475_vm7, %v202_v2 }
 0x268   :  { %318 = vmatpush1.msk.msra.mxu1 %vm475_vm7, %v201_v4 }
 0x269   :  { %319 = vmatmul.mubr.msk.f32.vlgmr.msra.gmra.mrb[0].mxu1 %vm94_vm8, %v205_v3 }
 0x26b   :  { %v286_v10 = vpop.permute.xlu0 %285 }
 0x33c   :  { %v275_v5 = vpop.f32.mrb[0].mxu1 }
 0x33d   :  { %v280_v6 = vadd.f32 %v275_v5, %v434_v7  ;;  %v277_v9 = vpop.f32.mrb[1].mxu1 }
 0x33e   :  { %v281_v11 = vadd.f32 %v277_v9, %v439_v8 }
 0x33f   :  { %v288_v12 = vadd.f32 %v286_v10, %v280_v6 }
 0x340   :  { %v289_v13 = vadd.f32 %v286_v10, %v281_v11 }
 0x341   :  { %290 = vst [vmem:[#allocation2] sm:$0xff] %v288_v12 }
 0x342   :  { %291 = vst [vmem:[#allocation2 + $0x8] sm:$0xff] %v289_v13 }
 0x343   :  { %361 = shalt.err (!%p358_p4)
}
 0x344   :  { %s362_s22 = scalar_lea.hbm %s547_s8, 256 }
 0x345   :  { %p363_p5 = scmp.ne.s32.totalorder %s547_s8, %s362_s22  ;;  %p366_p6 = scmp.lt.u32.totalorder %s362_s22, %s547_s8 }
 0x347   :  { %p368_p7 = pnand %p366_p6, %p363_p5 }
 0x349   :  { %371 = shalt.err (!%p368_p7)
}
 0x34a   :  { %301 = dma.vmem_to_hbm [thread:$0]  %s299_s19, 256, %s547_s8, [#allocation3]  }
 0x34b   :  { %372 = dma.done.wait [#allocation3], 256  }
 0x34c   :  { %373 = vsyncadd [#allocation3], 4294967040 }
 0x34d   :  { %305 = vsyncpa [#allocation3], 1 }

</bundles_post_ra>
